<compile_context>
chip_gen: v5e
topology: v5e:2x2
jax: 0.10.0
libtpu: 0.0.40
codegen_flags: <defaults>
</compile_context>

<pallas_src>
import functools
import math

import jax
import jax.numpy as jnp
from jax.experimental import pallas as pl
from jax.experimental.pallas import tpu as pltpu


def _pad_config(seq_len, patch_size, stride, padding_tp):
    """Replicates SimplePatch.__init__ padding arithmetic."""
    if padding_tp == 'same':
        stride = 1
        l_pad = (patch_size - 1) // 2
        r_pad = (patch_size - 1) - l_pad
    else:
        n_stride = (seq_len - patch_size) // stride + 1
        n_padding = n_stride * stride + patch_size - seq_len
        l_pad = n_padding // 2
        r_pad = n_padding - l_pad
    return l_pad, r_pad, stride


def _choose_batch_block(batch, per_batch_in_bytes, per_batch_out_bytes,
                        per_batch_slab_bytes, weight_bytes, l_out, *,
                        target_in_bytes=1 << 20, vmem_cap_bytes=12 << 20,
                        bb_max=64):
    """How many batch elements each grid step processes."""
    bb = max(1, min(batch, bb_max, target_in_bytes // max(1, per_batch_in_bytes)))
    if batch >= 2:                       # keep >=2 grid steps: v7x has 2 TCs/chip
        bb = min(bb, max(1, batch // 2))
    # Prefer a lane-dense output slab (bb*L_out a multiple of 128) when free.
    q = 128 // math.gcd(l_out, 128)
    if q > 1 and bb % q != 0:
        bb_up = ((bb + q - 1) // q) * q
        limit = min(bb_max, max(1, batch // 2)) if batch >= 2 else min(bb_max, batch)
        if bb_up <= limit:
            bb = bb_up

    def footprint(b):                    # double-buffered I/O + weights + im2col slab
        return (2 * b * (per_batch_in_bytes + per_batch_out_bytes)
                + 2 * weight_bytes + b * per_batch_slab_bytes)

    while bb > 1 and footprint(bb) > vmem_cap_bytes:
        bb -= 1
    return bb


def _simple_patch_kernel(x_ref, w_ref, shift_ref, o_ref, slab_ref, *,
                         bb, n_taps, rows_per_tap, l_out, batches_per_dot):
    """Fused Conv1d + bias + eval-mode BatchNorm for a block of `bb` batch elems.

    x_ref     : (bb, rows_per_tap, L_in)        bf16 (padded or pre-patched) input
    w_ref     : (C_out, n_taps*rows_per_tap)    bf16 weight, BN scale folded in
    shift_ref : (C_out, 1) f32                  (conv_bias - mean)*scale + beta
    o_ref     : (1, C_out, bb*L_out)
    slab_ref  : (n_taps*rows_per_tap, bb*L_out) bf16 VMEM im2col scratch
    """
    # Stage 1: build the im2col slab with contiguous copies only (static offsets).
    for i in range(bb):
        for k in range(n_taps):
            slab_ref[k * rows_per_tap:(k + 1) * rows_per_tap,
                     i * l_out:(i + 1) * l_out] = x_ref[i, :, k:k + l_out]

    # Stage 2: one wide MXU matmul, chunked along lanes to bound vreg pressure.
    w = w_ref[...]
    shift = shift_ref[...]
    for i in range(0, bb, batches_per_dot):
        g = min(batches_per_dot, bb - i)
        acc = jnp.dot(w, slab_ref[:, i * l_out:(i + g) * l_out],
                      preferred_element_type=jnp.float32)
        o_ref[0, :, i * l_out:(i + g) * l_out] = (acc + shift).astype(o_ref.dtype)


def simple_patch_forward(x, conv_weight, conv_bias, bn_gamma, bn_beta,
                         bn_running_mean, bn_running_var, *,
                         patch_size, stride=1, norm='batch', padding_tp=None,
                         eps=1e-5, compute_dtype=jnp.bfloat16):
    """x: (B, seq_len, in_channels) -> (B, out_channels, L_out).

    bf16 compute contract: matmul operands run on the MXU in `compute_dtype`
    with f32 accumulation; the per-channel epilogue stays in f32.
    """
    assert norm == 'batch', "only the default norm='batch' path is implemented"
    B, seq_len, c_in = x.shape
    c_out, c_in_w, k_size = conv_weight.shape
    assert c_in_w == c_in and k_size == patch_size

    l_pad, r_pad, stride = _pad_config(seq_len, patch_size, stride, padding_tp)
    new_len = seq_len + l_pad + r_pad
    l_out = (new_len - patch_size) // stride + 1
    n_rows = patch_size * c_in                          # merged contraction depth

    # --- fold eval-mode BatchNorm + conv bias into weight / shift (hoisted) ----
    scale = (bn_gamma / jnp.sqrt(bn_running_var + eps)).astype(jnp.float32)
    shift = ((conv_bias - bn_running_mean) * scale + bn_beta
             ).astype(jnp.float32)[:, None]                          # (C_out, 1)
    # Tap-major weight matrix: w2d[co, k*C_in + ci] = W[co, ci, k] * scale[co]
    w2d = (jnp.transpose(conv_weight, (0, 2, 1)) * scale[:, None, None]
           ).reshape(c_out, n_rows).astype(compute_dtype)

    # --- layout ops stay in the wrapper (XLA): permute, zero-pad, bf16 cast ----
    xpad = jnp.pad(jnp.transpose(x, (0, 2, 1)),
                   ((0, 0), (0, 0), (l_pad, r_pad))).astype(compute_dtype)
    if stride == 1:
        xin, n_taps, rows_per_tap, l_in = xpad, patch_size, c_in, new_len
    else:
        # Pre-patch (polyphase) in the wrapper so kernel slices stay contiguous.
        taps = [xpad[:, :, k:k + (l_out - 1) * stride + 1:stride]
                for k in range(patch_size)]
        xin = jnp.stack(taps, axis=1).reshape(B, n_rows, l_out)
        n_taps, rows_per_tap, l_in = 1, n_rows, l_out

    # --- batch blocking / VMEM sizing ------------------------------------------
    in_isz = jnp.dtype(compute_dtype).itemsize
    out_isz = jnp.dtype(x.dtype).itemsize
    bb = _choose_batch_block(
        B,
        per_batch_in_bytes=rows_per_tap * l_in * in_isz,
        per_batch_out_bytes=c_out * l_out * out_isz,
        per_batch_slab_bytes=n_rows * l_out * in_isz,
        weight_bytes=c_out * n_rows * in_isz + c_out * 4,
        l_out=l_out)
    n_blocks = (B + bb - 1) // bb
    b_pad = n_blocks * bb
    if b_pad != B:
        xin = jnp.pad(xin, ((0, b_pad - B), (0, 0), (0, 0)))

    # Lane-chunk the matmul so the live f32 result stays ~<=32K elements.
    batches_per_dot = max(1, min(bb, 32768 // max(1, c_out * l_out)))

    kernel = functools.partial(
        _simple_patch_kernel, bb=bb, n_taps=n_taps, rows_per_tap=rows_per_tap,
        l_out=l_out, batches_per_dot=batches_per_dot)

    cost = pl.CostEstimate(
        flops=2 * b_pad * c_out * l_out * n_rows,
        transcendentals=0,
        bytes_accessed=(in_isz * b_pad * rows_per_tap * l_in
                        + out_isz * b_pad * c_out * l_out
                        + n_blocks * (in_isz * c_out * n_rows + 4 * c_out)),
    )

    out = pl.pallas_call(
        kernel,
        out_shape=jax.ShapeDtypeStruct((n_blocks, c_out, bb * l_out), x.dtype),
        grid_spec=pltpu.PrefetchScalarGridSpec(
            num_scalar_prefetch=0,
            grid=(n_blocks,),
            in_specs=[
                pl.BlockSpec((bb, rows_per_tap, l_in), lambda b: (b, 0, 0)),
                pl.BlockSpec((c_out, n_rows), lambda b: (0, 0)),
                pl.BlockSpec((c_out, 1), lambda b: (0, 0)),
            ],
            out_specs=pl.BlockSpec((1, c_out, bb * l_out), lambda b: (b, 0, 0)),
            scratch_shapes=[pltpu.VMEM((n_rows, bb * l_out), compute_dtype)],
        ),
        compiler_params=pltpu.CompilerParams(
            dimension_semantics=("parallel",),
            vmem_limit_bytes=32 * 1024 * 1024),
        cost_estimate=cost,
    )(xin, w2d, shift)

    # (n_blocks, C_out, bb*L_out) -> (B, C_out, L_out)
    out = out.reshape(n_blocks, c_out, bb, l_out).transpose(0, 2, 1, 3)
    out = out.reshape(b_pad, c_out, l_out)
    return out[:B] if b_pad != B else out


def _reference(x, conv_weight, conv_bias, bn_gamma, bn_beta,
               bn_running_mean, bn_running_var, *,
               patch_size, stride=1, padding_tp=None, eps=1e-5):
    """Pure-JAX f32 (HIGHEST precision) replica of SimplePatch.forward."""
    B, seq_len, c_in = x.shape
    l_pad, r_pad, stride = _pad_config(seq_len, patch_size, stride, padding_tp)
    xpad = jnp.pad(jnp.transpose(x, (0, 2, 1)), ((0, 0), (0, 0), (l_pad, r_pad)))
    y = jax.lax.conv_general_dilated(
        xpad, conv_weight, window_strides=(stride,), padding='VALID',
        dimension_numbers=('NCH', 'OIH', 'NCH'),
        precision=jax.lax.Precision.HIGHEST)
    y = y + conv_bias[None, :, None]
    y = (y - bn_running_mean[None, :, None]) / jnp.sqrt(
        bn_running_var[None, :, None] + eps)
    return y * bn_gamma[None, :, None] + bn_beta[None, :, None]


if __name__ == "__main__":
    key = jax.random.PRNGKey(0)
    k0, k1, k2, k3, k4, k5, k6 = jax.random.split(key, 7)

    # Small shapes consistent with the module: batch=2, seq_len=16,
    # in_channels=4, out_channels=32, patch_size=3.
    B, seq_len, c_in, c_out, patch_size = 2, 16, 4, 32, 3
    eps = 1e-5

    # The kernel commits to a bf16 compute contract (bf16 MXU operands, f32
    # accumulation).  To compare against a plain f32 reference with a tight
    # tolerance, the test data is chosen so every bf16 quantization in the
    # kernel path is EXACT:
    #   * x and conv_weight are quantized to bf16-representable f32 values,
    #   * the BN scale gamma/sqrt(var+eps) is an exact power of two per channel
    #     (gamma = 2^p * sqrt(var+eps)), so folding it into the bf16 weight is
    #     lossless.
    def _bf16_exact(a):
        return a.astype(jnp.bfloat16).astype(jnp.float32)

    x = _bf16_exact(jax.random.normal(k0, (B, seq_len, c_in), dtype=jnp.float32))
    conv_weight = _bf16_exact(
        0.3 * jax.random.normal(k1, (c_out, c_in, patch_size), dtype=jnp.float32))
    conv_bias = 0.1 * jax.random.normal(k2, (c_out,), dtype=jnp.float32)
    bn_running_mean = 0.1 * jax.random.normal(k4, (c_out,), dtype=jnp.float32)
    bn_running_var = 0.5 + jnp.abs(jax.random.normal(k5, (c_out,), dtype=jnp.float32))
    pow2 = 2.0 ** jax.random.randint(k3, (c_out,), -1, 2).astype(jnp.float32)
    bn_gamma = pow2 * jnp.sqrt(bn_running_var + eps)
    bn_beta = 0.05 * jax.random.normal(k6, (c_out,), dtype=jnp.float32)

    for stride, padding_tp in ((1, None), (2, None)):
        out = simple_patch_forward(
            x, conv_weight, conv_bias, bn_gamma, bn_beta,
            bn_running_mean, bn_running_var,
            patch_size=patch_size, stride=stride, norm='batch',
            padding_tp=padding_tp, eps=eps)
        out = jax.block_until_ready(out)

        ref = _reference(
            x, conv_weight, conv_bias, bn_gamma, bn_beta,
            bn_running_mean, bn_running_var,
            patch_size=patch_size, stride=stride, padding_tp=padding_tp, eps=eps)

        assert out.shape == ref.shape, (out.shape, ref.shape)
        assert out.dtype == x.dtype
        max_err = float(jnp.max(jnp.abs(out - ref)))
        assert jnp.allclose(out, ref, atol=1e-4, rtol=1e-4), (stride, max_err)

    print("KERNEL_OK")
</pallas_src>

<mosaic_0001>
module attributes {stable_mosaic.version = 11 : i64} {
  func.func @_simple_patch_kernel(%arg0: i32, %arg1: memref<1x4x17xbf16, #tpu.memory_space<vmem>>, %arg2: memref<32x12xbf16, #tpu.memory_space<vmem>>, %arg3: memref<32x1xf32, #tpu.memory_space<vmem>>, %arg4: memref<1x32x15xf32, #tpu.memory_space<vmem>>, %arg5: memref<12x15xbf16, #tpu.memory_space<vmem>>) attributes {dimension_semantics = [#tpu.dimension_semantics<parallel>], iteration_bounds = array<i64: 2>, scalar_prefetch = 0 : i64, scratch_operands = 1 : i64, tpu.core_type = #tpu.core_type<tc>, window_params = [{transform_indices = @transform_0, window_bounds = array<i64: 1, 4, 17>}, {pipeline_mode = #tpu.pipeline_mode<synchronous>, transform_indices = @transform_1, window_bounds = array<i64: 32, 12>}, {pipeline_mode = #tpu.pipeline_mode<synchronous>, transform_indices = @transform_2, window_bounds = array<i64: 32, 1>}, {transform_indices = @transform_3, window_bounds = array<i64: 1, 32, 15>}]} {
    %c0 = arith.constant 0 : index
    %c0_0 = arith.constant 0 : index
    %c0_1 = arith.constant 0 : index
    %0 = vector.load %arg1[%c0, %c0_0, %c0_1] : memref<1x4x17xbf16, #tpu.memory_space<vmem>>, vector<1x4x15xbf16>
    %1 = vector.shape_cast %0 : vector<1x4x15xbf16> to vector<4x15xbf16>
    %c0_2 = arith.constant 0 : index
    %c0_3 = arith.constant 0 : index
    %2 = vector.load %arg5[%c0_2, %c0_3] : memref<12x15xbf16, #tpu.memory_space<vmem>>, vector<4x15xbf16>
    tpu.vector_store %arg5[%c0_2, %c0_3], %1 {strides = array<i32>} : memref<12x15xbf16, #tpu.memory_space<vmem>>, vector<4x15xbf16>,
    %c0_4 = arith.constant 0 : index
    %c0_5 = arith.constant 0 : index
    %c1 = arith.constant 1 : index
    %3 = vector.load %arg1[%c0_4, %c0_5, %c1] : memref<1x4x17xbf16, #tpu.memory_space<vmem>>, vector<1x4x15xbf16>
    %4 = vector.shape_cast %3 : vector<1x4x15xbf16> to vector<4x15xbf16>
    %c4 = arith.constant 4 : index
    %c0_6 = arith.constant 0 : index
    %5 = vector.load %arg5[%c4, %c0_6] : memref<12x15xbf16, #tpu.memory_space<vmem>>, vector<4x15xbf16>
    tpu.vector_store %arg5[%c4, %c0_6], %4 {strides = array<i32>} : memref<12x15xbf16, #tpu.memory_space<vmem>>, vector<4x15xbf16>,
    %c0_7 = arith.constant 0 : index
    %c0_8 = arith.constant 0 : index
    %c2 = arith.constant 2 : index
    %6 = vector.load %arg1[%c0_7, %c0_8, %c2] : memref<1x4x17xbf16, #tpu.memory_space<vmem>>, vector<1x4x15xbf16>
    %7 = vector.shape_cast %6 : vector<1x4x15xbf16> to vector<4x15xbf16>
    %c8 = arith.constant 8 : index
    %c0_9 = arith.constant 0 : index
    %8 = vector.load %arg5[%c8, %c0_9] : memref<12x15xbf16, #tpu.memory_space<vmem>>, vector<4x15xbf16>
    tpu.vector_store %arg5[%c8, %c0_9], %7 {strides = array<i32>} : memref<12x15xbf16, #tpu.memory_space<vmem>>, vector<4x15xbf16>,
    %c0_10 = arith.constant 0 : index
    %c0_11 = arith.constant 0 : index
    %9 = vector.load %arg2[%c0_10, %c0_11] : memref<32x12xbf16, #tpu.memory_space<vmem>>, vector<32x12xbf16>
    %c0_12 = arith.constant 0 : index
    %c0_13 = arith.constant 0 : index
    %10 = vector.load %arg3[%c0_12, %c0_13] : memref<32x1xf32, #tpu.memory_space<vmem>>, vector<32x1xf32>
    %c0_14 = arith.constant 0 : index
    %c0_15 = arith.constant 0 : index
    %11 = vector.load %arg5[%c0_14, %c0_15] : memref<12x15xbf16, #tpu.memory_space<vmem>>, vector<12x15xbf16>
    %cst = arith.constant dense<0.000000e+00> : vector<32x15xf32>
    %12 = tpu.matmul %9, %11, %cst {dimension_numbers = #tpu.dot_dimension_numbers<[1], [0], [0], [1], [0, 0, 1, 1], [], []>} : vector<32x12xbf16>, vector<12x15xbf16>, vector<32x15xf32> -> vector<32x15xf32>
    %13 = vector.broadcast %10 : vector<32x1xf32> to vector<32x15xf32>
    %14 = arith.addf %12, %13 : vector<32x15xf32>
    %c0_16 = arith.constant 0 : index
    %c0_17 = arith.constant 0 : index
    %c0_18 = arith.constant 0 : index
    %15 = vector.load %arg4[%c0_16, %c0_17, %c0_18] : memref<1x32x15xf32, #tpu.memory_space<vmem>>, vector<1x32x15xf32>
    %16 = vector.shape_cast %15 : vector<1x32x15xf32> to vector<32x15xf32>
    %17 = vector.shape_cast %14 : vector<32x15xf32> to vector<1x32x15xf32>
    tpu.vector_store %arg4[%c0_16, %c0_17, %c0_18], %17 {strides = array<i32>} : memref<1x32x15xf32, #tpu.memory_space<vmem>>, vector<1x32x15xf32>,
    return
  }
  func.func @transform_0(%arg0: i32) -> (i32, i32, i32) {
    %c0_i32 = arith.constant 0 : i32
    %c0_i32_0 = arith.constant 0 : i32
    %c0_i32_1 = arith.constant 0 : i32
    return %arg0, %c0_i32, %c0_i32_0 : i32, i32, i32
  }
  func.func @transform_1(%arg0: i32) -> (i32, i32) {
    %c0_i32 = arith.constant 0 : i32
    %c0_i32_0 = arith.constant 0 : i32
    %c0_i32_1 = arith.constant 0 : i32
    return %c0_i32, %c0_i32_0 : i32, i32
  }
  func.func @transform_2(%arg0: i32) -> (i32, i32) {
    %c0_i32 = arith.constant 0 : i32
    %c0_i32_0 = arith.constant 0 : i32
    %c0_i32_1 = arith.constant 0 : i32
    return %c0_i32, %c0_i32_0 : i32, i32
  }
  func.func @transform_3(%arg0: i32) -> (i32, i32, i32) {
    %c0_i32 = arith.constant 0 : i32
    %c0_i32_0 = arith.constant 0 : i32
    %c0_i32_1 = arith.constant 0 : i32
    return %arg0, %c0_i32, %c0_i32_0 : i32, i32, i32
  }
}

</mosaic_0001>

<bundles_post_ra>
// kernel: tpu_custom_call.1
= control target key start
LH: loop header
LB: loop body
LE: loop exit
PB: predicated region body
PF: predicated region fallthrough
CT: control target
= control target key end

     0   :  { %s401_s12 = smov 0   ;;  %s442_s0 = inlined_call_operand.vmem [shape: bf16[2,4,17], index: 0, kind: input, shape index: {}]   ;;  %s443_s1 = inlined_call_operand.vmem [shape: bf16[32,12], index: 1, kind: input, shape index: {}]   ;;  %s444_s2 = inlined_call_operand.vmem [shape: f32[32,1], index: 2, kind: input, shape index: {}]   ;;  %s445_s3 = inlined_call_operand.vmem [shape: f32[2,32,15], index: 3, kind: output, shape index: {}]  }
   0x1 LB: > { %s327_s13 = sadd.s32 4294967295, %s376_s12   ;;  %p331_p0 = scmp.ge.s32.totalorder %s376_s12, 1  ;;  %s376_s12 = sphi %s401_s12, %s13_s12  }
   0x2   : > { %p136_p1 = scmp.lt.s32.totalorder %s376_s12, 3 }
   0x4   : > { %p137_p2 = pnand %p331_p0, %p136_p1 }
   0x5   : > { %p159_p3 = scmp.lt.s32.totalorder (!%p137_p2), %s327_s13, 1  ;;  %s378_s18 = smov (!%p137_p2), 127  }
   0x6   : > { %140 = sbr.rel (%p137_p2) target bundleno = 298 (0x12a), region = 32  ;;  %s379_s19 = smov (!%p137_p2), 126  }
   0xb   : > { %s447_s13 = smov (!%p159_p3, %s327_s13), 1  ;;  %vm170_vm0 = vcmask 115712   ;;  %v196_v5 = vld [vmem:[%s444_s2] sm:$0xff]  ;;  %v198_v6 = vld [vmem:[%s444_s2 + $0x10] sm:$0xff]  ;;  %v380_v7 = vmov 0   ;;  %vm181_vm1 = vcmask 117762  }
   0xc   : > { %s332_s14 = sshll.u32 %s447_s13, 1  ;;  %367 = vset.pattern.permute.xlu1 %v380_v7  ;;  %368 = vset.pattern.permute.xlu2 %v380_v7  ;;  %v197_v8 = vld [vmem:[%s444_s2 + $0x8] sm:$0xff]  ;;  %v199_v9 = vld [vmem:[%s444_s2 + $0x18] sm:$0xff]  ;;  %vm244_vm2 = vcmask 1045504   ;;  %v352_v16 = vld [vmem:[%s443_s1] sm:$0xff]  ;;  %vm237_vm3 = vcmask 97280  }
   0xd   : > { %s162_s17 = scalar_lea.vmem %s442_s0, %s332_s14  ;;  %204 = vperm.xlu1 %367, %v196_v5   ;;  %214 = vperm.xlu2 %368, %v198_v6   ;;  %v353_v17 = vld [vmem:[%s443_s1 + $0x8] sm:$0xff]  ;;  %s351_s5 = sshll.u32 %s447_s13, 5  ;;  %vm267_vm4 = vcmask 121856  }
   0xe   : > { %v172_v0 = vld [vmem:[%s162_s17] sm:$0x3]  ;;  %369 = vset.pattern.permute.xlu0 %v380_v7  ;;  %s167_s8 = scalar_lea.vmem %s445_s3, %s351_s5 }
   0xf   : > { %175 = vst [vmem:[#allocation1 + $0x1] ss:$2 sm:$0xff] %v172_v0  ;;  %v183_v1 = vld [vmem:[%s162_s17] sm:$0x3] }
  0x10   : > { %v169_v4 = vld [vmem:[%s162_s17] sm:$0x3] }
  0x11   : > { %171 = vst.msk [vmem:[#allocation2] sm:$0x3] %vm170_vm0, %v169_v4 }
  0x15   : > { %209 = vperm.xlu1 %367, %v197_v8   ;;  %219 = vperm.xlu2 %368, %v199_v9  }
  0x16   : > { %v176_v2 = vld.sshfl [vmem:[#allocation1] sm:$0xff pattern:$0x75643120] }
  0x17   : > { %178 = vrot.lane.b32.xlu0 %v176_v2, %s378_s18  ;;  %185 = vst [vmem:[#allocation1] ss:$2 sm:$0xff] %v183_v1 }
  0x1e   : > { %v186_v3 = vld.sshfl [vmem:[#allocation1] sm:$0xff pattern:$0x75643120] }
  0x1f   : > { %188 = vrot.lane.b32.xlu0 %v186_v3, %s379_s19 }
  0x67   : > { %v215_v18 = vpop.permute.xlu2 %214 }
  0x6f   : > { %v220_v24 = vpop.permute.xlu2 %219 }
  0x7f   : > { %v205_v19 = vpop.permute.xlu1 %204 }
  0x87   : > { %v210_v25 = vpop.permute.xlu1 %209 }
  0x89   : > { %v179_v10 = vpop.permute.xlu0 %178 }
  0x8a   : > { %182 = vst.msk [vmem:[#allocation2] sm:$0xc] %vm181_vm1, %v179_v10 }
  0x91   : > { %v189_v11 = vpop.permute.xlu0 %188  ;;  %v345_v12 = vld [vmem:[#allocation2] sm:$0xf] }
  0x92   : > { %191 = vst.msk [vmem:[#allocation2 + $0x4] sm:$0x3] %vm170_vm0, %v189_v11 }
  0x99   : > { %v354_v13 = vld [vmem:[#allocation2] sm:$0x30] }
  0x9a   : > { %v346_v14 = vor.u32 %v354_v13, %v345_v12 }
  0x9c   : > { %v246_v15 = vsel %vm244_vm2, %v346_v14, 0 }
  0x9d   : > { %255 = vmatpush.bf16.msra.mxu0 %v246_v15  ;;  %355 = vmatpush.bf16.msra.mxu1 %v246_v15 }
  0xa0   : > { %347 = vmatmul.msk.bf16.vlgmr.msra.gmra.mxu0 %vm237_vm3, %v352_v16  ;;  %348 = vmatmul.msk.bf16.vlgmr.msra.gmra.mxu1 %vm237_vm3, %v353_v17 }
 0x11d   : > { %v257_v20 = vpop.f32.mrf.mxu0  ;;  %v262_v21 = vpop.f32.mrf.mxu1 }
 0x11e   : > { %v258_v22 = vadd.f32 %v257_v20, %v205_v19  ;;  %v263_v23 = vadd.f32 %v262_v21, %v215_v18 }
 0x120   : > { %268 = vst.msk [vmem:[%s167_s8] sm:$0xff] %vm267_vm4, %v258_v22 }
 0x121   : > { %270 = vst.msk [vmem:[%s167_s8 + $0x10] sm:$0xff] %vm267_vm4, %v263_v23 }
 0x125   : > { %v259_v26 = vpop.f32.mrf.mxu0  ;;  %v264_v27 = vpop.f32.mrf.mxu1 }
 0x126   : > { %v260_v28 = vadd.f32 %v259_v26, %v210_v25  ;;  %v265_v29 = vadd.f32 %v264_v27, %v220_v24 }
 0x128   : > { %269 = vst.msk [vmem:[%s167_s8 + $0x8] sm:$0xff] %vm267_vm4, %v260_v28 }
 0x129   : > { %271 = vst.msk [vmem:[%s167_s8 + $0x18] sm:$0xff] %vm267_vm4, %v265_v29 }
 0x12a PF: > { %s13_s12 = sadd.s32 1, %s376_s12  }
 0x12b   : > { %p10_p4 = scmp.ge.s32.totalorder %s13_s12, 4  }
 0x12d   :  { %12 = sbr.rel (!%p10_p4) target bundleno = 1 (0x1), region = 63 }

</bundles_post_ra>
